<compile_context>
chip_gen: v7x
topology: tpu7x:2x2x1
jax: 0.10.0
libtpu: 0.0.40
codegen_flags: <defaults>
</compile_context>

<pallas_src>
import jax
import jax.numpy as jnp
from jax.experimental import pallas as pl
from jax.experimental.pallas import tpu as pltpu

N_EMBD = 384           # input embedding dim hardcoded in the PyTorch module
HEAD_SIZE = 64         # head_size constructor arg (e.g. N_EMBD // n_head = 384 // 6)
NEG_INF = -1e30        # additive mask value; exp underflows to exactly 0 in f32


def head_kernel(x_ref, wk_ref, wq_ref, wv_ref, o_ref):
    TB, T, C = x_ref.shape
    hs = wk_ref.shape[1]

    # ---- K/Q/V projections on a tall (TB*T, C) slab: bf16 MXU, f32 accumulate ----
    x = x_ref[...].reshape(TB * T, C).astype(jnp.bfloat16)
    k = jnp.dot(x, wk_ref[...], preferred_element_type=jnp.float32)   # (TB*T, hs)
    q = jnp.dot(x, wq_ref[...], preferred_element_type=jnp.float32)
    v = jnp.dot(x, wv_ref[...], preferred_element_type=jnp.float32)

    # Fold the attention scale into q once (one (TB*T, hs) VPU multiply).
    q = q * (float(hs) ** -0.5)

    q = q.reshape(TB, T, hs).astype(jnp.bfloat16)
    k = k.reshape(TB, T, hs).astype(jnp.bfloat16)
    v = v.reshape(TB, T, hs).astype(jnp.bfloat16)

    # Additive causal mask, built once per invocation (one VPU add per use,
    # no select; every row keeps its diagonal so no fully-masked rows / NaNs).
    row = jax.lax.broadcasted_iota(jnp.int32, (T, T), 0)
    col = jax.lax.broadcasted_iota(jnp.int32, (T, T), 1)
    add_mask = jnp.where(row >= col, 0.0, NEG_INF).astype(jnp.float32)

    # ---- attention, batched over the TB batch elements in this block ----
    scores = jnp.einsum("btd,bsd->bts", q, k,
                        preferred_element_type=jnp.float32)           # (TB, T, T)
    scores = scores + add_mask[None, :, :]

    m = jnp.max(scores, axis=-1, keepdims=True)
    p = jnp.exp(scores - m)
    denom = jnp.sum(p, axis=-1, keepdims=True)
    p = p * pl.reciprocal(denom, approx=True)
    # TODO(synk): attention dropout (p=0.2) is identity in eval mode; training-mode
    # RNG dropout is out of scope.

    out = jnp.einsum("bts,bsd->btd", p.astype(jnp.bfloat16), v,
                     preferred_element_type=jnp.float32)              # (TB, T, hs)
    o_ref[...] = out.astype(o_ref.dtype)


def head_forward(x, wk, wq, wv, *, max_block_rows=256):
    """x: (B, T, C) f32; wk/wq/wv: (C, head_size). Returns (B, T, head_size) f32."""
    B, T, C = x.shape
    hs = wk.shape[1]

    # Largest batch tile TB that divides B and keeps TB*T <= max_block_rows
    # (MXU fill vs. VMEM headroom; 256 rows also fits v7x's 32 MiB scoped default).
    TB = 1
    for cand in range(1, B + 1):
        if B % cand == 0 and cand * T <= max(max_block_rows, T):
            TB = cand

    # Ship weights as bf16: native MXU dtype, half the HBM traffic / VMEM.
    wk_b = wk.astype(jnp.bfloat16)
    wq_b = wq.astype(jnp.bfloat16)
    wv_b = wv.astype(jnp.bfloat16)

    w_spec = pl.BlockSpec((C, hs), lambda b: (0, 0))
    return pl.pallas_call(
        head_kernel,
        out_shape=jax.ShapeDtypeStruct((B, T, hs), jnp.float32),
        grid=(B // TB,),
        in_specs=[
            pl.BlockSpec((TB, T, C), lambda b: (b, 0, 0)),
            w_spec, w_spec, w_spec,
        ],
        out_specs=pl.BlockSpec((TB, T, hs), lambda b: (b, 0, 0)),
        compiler_params=pltpu.CompilerParams(dimension_semantics=("parallel",)),
    )(x, wk_b, wq_b, wv_b)


def head_reference(x, wk, wq, wv):
    """Pure-JAX f32 reference mirroring the PyTorch Head.forward (eval mode)."""
    B, T, C = x.shape
    hs = wk.shape[1]
    k = x @ wk
    q = x @ wq
    v = x @ wv
    wei = jnp.einsum("btd,bsd->bts", q, k) * (hs ** -0.5)
    mask = jnp.tril(jnp.ones((T, T), bool))
    wei = jnp.where(mask[None], wei, -jnp.inf)
    wei = jax.nn.softmax(wei, axis=-1)
    return jnp.einsum("bts,bsd->btd", wei, v)


if __name__ == "__main__":
    key = jax.random.PRNGKey(0)
    kx, k1, k2, k3 = jax.random.split(key, 4)

    B, T = 2, 8                     # T <= BLOCK_SIZE (256); C must equal N_EMBD (384)
    x = jax.random.normal(kx, (B, T, N_EMBD), jnp.float32)
    s = 0.02
    wk = s * jax.random.normal(k1, (N_EMBD, HEAD_SIZE), jnp.float32)
    wq = s * jax.random.normal(k2, (N_EMBD, HEAD_SIZE), jnp.float32)
    wv = s * jax.random.normal(k3, (N_EMBD, HEAD_SIZE), jnp.float32)

    out = head_forward(x, wk, wq, wv)
    out = jax.block_until_ready(out)

    ref = head_reference(x, wk, wq, wv)
    assert out.shape == (B, T, HEAD_SIZE)
    # bf16 matmuls + approx reciprocal => looser tolerance than a pure-f32 kernel.
    assert jnp.allclose(out, ref, atol=2e-2, rtol=2e-2), "mismatch vs reference"

    print("KERNEL_OK")
</pallas_src>

<mosaic_0001>
module attributes {stable_mosaic.version = 11 : i64} {
  func.func @head_kernel(%arg0: i32, %arg1: memref<2x8x384xf32, #tpu.memory_space<vmem>>, %arg2: memref<384x64xbf16, #tpu.memory_space<vmem>>, %arg3: memref<384x64xbf16, #tpu.memory_space<vmem>>, %arg4: memref<384x64xbf16, #tpu.memory_space<vmem>>, %arg5: memref<2x8x64xf32, #tpu.memory_space<vmem>>) attributes {dimension_semantics = [#tpu.dimension_semantics<parallel>], iteration_bounds = array<i64: 1>, scalar_prefetch = 0 : i64, scratch_operands = 0 : i64, tpu.core_type = #tpu.core_type<tc>, window_params = [{transform_indices = @transform_0, window_bounds = array<i64: 2, 8, 384>}, {pipeline_mode = #tpu.pipeline_mode<synchronous>, transform_indices = @transform_1, window_bounds = array<i64: 384, 64>}, {pipeline_mode = #tpu.pipeline_mode<synchronous>, transform_indices = @transform_2, window_bounds = array<i64: 384, 64>}, {pipeline_mode = #tpu.pipeline_mode<synchronous>, transform_indices = @transform_3, window_bounds = array<i64: 384, 64>}, {transform_indices = @transform_4, window_bounds = array<i64: 2, 8, 64>}]} {
    %c0 = arith.constant 0 : index
    %c0_0 = arith.constant 0 : index
    %c0_1 = arith.constant 0 : index
    %0 = vector.load %arg1[%c0, %c0_0, %c0_1] : memref<2x8x384xf32, #tpu.memory_space<vmem>>, vector<2x8x384xf32>
    %1 = vector.shape_cast %0 : vector<2x8x384xf32> to vector<16x384xf32>
    %2 = arith.truncf %1 : vector<16x384xf32> to vector<16x384xbf16>
    %c0_2 = arith.constant 0 : index
    %c0_3 = arith.constant 0 : index
    %3 = vector.load %arg2[%c0_2, %c0_3] : memref<384x64xbf16, #tpu.memory_space<vmem>>, vector<384x64xbf16>
    %cst = arith.constant dense<0.000000e+00> : vector<16x64xf32>
    %4 = tpu.matmul %2, %3, %cst {dimension_numbers = #tpu.dot_dimension_numbers<[1], [0], [0], [1], [0, 0, 1, 1], [], []>} : vector<16x384xbf16>, vector<384x64xbf16>, vector<16x64xf32> -> vector<16x64xf32>
    %c0_4 = arith.constant 0 : index
    %c0_5 = arith.constant 0 : index
    %5 = vector.load %arg3[%c0_4, %c0_5] : memref<384x64xbf16, #tpu.memory_space<vmem>>, vector<384x64xbf16>
    %cst_6 = arith.constant dense<0.000000e+00> : vector<16x64xf32>
    %6 = tpu.matmul %2, %5, %cst_6 {dimension_numbers = #tpu.dot_dimension_numbers<[1], [0], [0], [1], [0, 0, 1, 1], [], []>} : vector<16x384xbf16>, vector<384x64xbf16>, vector<16x64xf32> -> vector<16x64xf32>
    %c0_7 = arith.constant 0 : index
    %c0_8 = arith.constant 0 : index
    %7 = vector.load %arg4[%c0_7, %c0_8] : memref<384x64xbf16, #tpu.memory_space<vmem>>, vector<384x64xbf16>
    %cst_9 = arith.constant dense<0.000000e+00> : vector<16x64xf32>
    %8 = tpu.matmul %2, %7, %cst_9 {dimension_numbers = #tpu.dot_dimension_numbers<[1], [0], [0], [1], [0, 0, 1, 1], [], []>} : vector<16x384xbf16>, vector<384x64xbf16>, vector<16x64xf32> -> vector<16x64xf32>
    %cst_10 = arith.constant 1.250000e-01 : f32
    %9 = vector.broadcast %cst_10 : f32 to vector<16x64xf32>
    %10 = arith.mulf %6, %9 : vector<16x64xf32>
    %11 = vector.shape_cast %10 : vector<16x64xf32> to vector<2x8x64xf32>
    %12 = arith.truncf %11 : vector<2x8x64xf32> to vector<2x8x64xbf16>
    %13 = vector.shape_cast %4 : vector<16x64xf32> to vector<2x8x64xf32>
    %14 = arith.truncf %13 : vector<2x8x64xf32> to vector<2x8x64xbf16>
    %15 = vector.shape_cast %8 : vector<16x64xf32> to vector<2x8x64xf32>
    %16 = arith.truncf %15 : vector<2x8x64xf32> to vector<2x8x64xbf16>
    %17 = tpu.iota {dimensions = array<i32: 0>} : vector<8x8xi32>
    %18 = tpu.iota {dimensions = array<i32: 1>} : vector<8x8xi32>
    %19 = arith.cmpi sge, %17, %18 : vector<8x8xi32>
    %cst_11 = arith.constant 0.000000e+00 : f32
    %cst_12 = arith.constant -1.000000e+30 : f32
    %20 = vector.broadcast %cst_11 : f32 to vector<8x8xf32>
    %21 = vector.broadcast %cst_12 : f32 to vector<8x8xf32>
    %22 = arith.select %19, %20, %21 : vector<8x8xi1>, vector<8x8xf32>
    "tpu.trace_start"() <{level = 10 : i32, message = "btd,bsd->bts"}> : () -> ()
    %cst_13 = arith.constant dense<0.000000e+00> : vector<2x8x8xf32>
    %23 = tpu.matmul %12, %14, %cst_13 {dimension_numbers = #tpu.dot_dimension_numbers<[2], [2], [1], [1], [0, 0, 0, 1, 1, 1], [0], [0]>} : vector<2x8x64xbf16>, vector<2x8x64xbf16>, vector<2x8x8xf32> -> vector<2x8x8xf32>
    "tpu.trace_stop"() : () -> ()
    %24 = vector.shape_cast %22 : vector<8x8xf32> to vector<1x8x8xf32>
    %25 = vector.broadcast %24 : vector<1x8x8xf32> to vector<2x8x8xf32>
    %26 = arith.addf %23, %25 : vector<2x8x8xf32>
    %cst_14 = arith.constant dense<0xFF800000> : vector<2x8xf32>
    %27 = vector.multi_reduction <maximumf>, %26, %cst_14 [2] : vector<2x8x8xf32> to vector<2x8xf32>
    %28 = vector.shape_cast %27 : vector<2x8xf32> to vector<2x8x1xf32>
    %29 = vector.broadcast %28 : vector<2x8x1xf32> to vector<2x8x8xf32>
    %30 = arith.subf %26, %29 : vector<2x8x8xf32>
    %31 = math.exp %30 : vector<2x8x8xf32>
    %cst_15 = arith.constant dense<0.000000e+00> : vector<2x8xf32>
    %32 = vector.multi_reduction <add>, %31, %cst_15 [2] : vector<2x8x8xf32> to vector<2x8xf32>
    %33 = vector.shape_cast %32 : vector<2x8xf32> to vector<2x8x1xf32>
    %34 = tpu.reciprocal %33 {approx = true} : vector<2x8x1xf32> -> vector<2x8x1xf32>
    %35 = vector.broadcast %34 : vector<2x8x1xf32> to vector<2x8x8xf32>
    %36 = arith.mulf %31, %35 : vector<2x8x8xf32>
    %37 = arith.truncf %36 : vector<2x8x8xf32> to vector<2x8x8xbf16>
    "tpu.trace_start"() <{level = 10 : i32, message = "bts,bsd->btd"}> : () -> ()
    %cst_16 = arith.constant dense<0.000000e+00> : vector<2x8x64xf32>
    %38 = tpu.matmul %37, %16, %cst_16 {dimension_numbers = #tpu.dot_dimension_numbers<[2], [1], [1], [2], [0, 0, 0, 1, 1, 2], [0], [0]>} : vector<2x8x8xbf16>, vector<2x8x64xbf16>, vector<2x8x64xf32> -> vector<2x8x64xf32>
    "tpu.trace_stop"() : () -> ()
    %c0_17 = arith.constant 0 : index
    %c0_18 = arith.constant 0 : index
    %c0_19 = arith.constant 0 : index
    %39 = vector.load %arg5[%c0_17, %c0_18, %c0_19] : memref<2x8x64xf32, #tpu.memory_space<vmem>>, vector<2x8x64xf32>
    tpu.vector_store %arg5[%c0_17, %c0_18, %c0_19], %38 {strides = array<i32>} : memref<2x8x64xf32, #tpu.memory_space<vmem>>, vector<2x8x64xf32>,
    return
  }
  func.func @transform_0(%arg0: i32) -> (i32, i32, i32) {
    %c0_i32 = arith.constant 0 : i32
    %c0_i32_0 = arith.constant 0 : i32
    %c0_i32_1 = arith.constant 0 : i32
    return %arg0, %c0_i32, %c0_i32_0 : i32, i32, i32
  }
  func.func @transform_1(%arg0: i32) -> (i32, i32) {
    %c0_i32 = arith.constant 0 : i32
    %c0_i32_0 = arith.constant 0 : i32
    %c0_i32_1 = arith.constant 0 : i32
    return %c0_i32, %c0_i32_0 : i32, i32
  }
  func.func @transform_2(%arg0: i32) -> (i32, i32) {
    %c0_i32 = arith.constant 0 : i32
    %c0_i32_0 = arith.constant 0 : i32
    %c0_i32_1 = arith.constant 0 : i32
    return %c0_i32, %c0_i32_0 : i32, i32
  }
  func.func @transform_3(%arg0: i32) -> (i32, i32) {
    %c0_i32 = arith.constant 0 : i32
    %c0_i32_0 = arith.constant 0 : i32
    %c0_i32_1 = arith.constant 0 : i32
    return %c0_i32, %c0_i32_0 : i32, i32
  }
  func.func @transform_4(%arg0: i32) -> (i32, i32, i32) {
    %c0_i32 = arith.constant 0 : i32
    %c0_i32_0 = arith.constant 0 : i32
    %c0_i32_1 = arith.constant 0 : i32
    return %arg0, %c0_i32, %c0_i32_0 : i32, i32, i32
  }
}

</mosaic_0001>

<bundles_post_ra>
// kernel: tpu_custom_call.1
= control target key start
LH: loop header
LB: loop body
LE: loop exit
PB: predicated region body
PF: predicated region fallthrough
CT: control target
= control target key end

     0   :  { %v1464_v1 = vmov 0.0   ;;  %vm1465_vm0 = vmmov 0   ;;  %s1810_s0 = inlined_call_operand.vmem [shape: f32[2,8,384], index: 0, kind: input, shape index: {}]   ;;  %s1811_s1 = inlined_call_operand.vmem [shape: bf16[384,64], index: 1, kind: input, shape index: {}]   ;;  %s1812_s2 = inlined_call_operand.vmem [shape: bf16[384,64], index: 2, kind: input, shape index: {}]   ;;  %s1813_s3 = inlined_call_operand.vmem [shape: bf16[384,64], index: 3, kind: input, shape index: {}]   ;;  %s1814_s4 = inlined_call_operand.hbm [shape: f32[2,8,64], index: 4, kind: output, shape index: {}]  }
   0x1   :  { %v1360_v0 = vld [vmem:[%s1811_s1 + $0x40] sm:$0xff]   ;;  %1270 = vmatprep.subr.bf16.mxu1 %v1464_v1  ;;  %1286 = vmatprep.mubr.msk.bf16.mxu1 %vm1465_vm0, %v1464_v1  ;;  %v1363_v4 = vld [vmem:[%s1811_s1 + $0x48] sm:$0xff]   ;;  %v1366_v7 = vld [vmem:[%s1811_s1 + $0x50] sm:$0xff]  }
   0x2   :  { %v1361_v2 = vld [vmem:[%s1811_s1] sm:$0xff]   ;;  %1169 = vmatprep.subr.bf16.mxu0 %v1360_v0  ;;  %v1364_v5 = vld [vmem:[%s1811_s1 + $0x8] sm:$0xff]   ;;  %v1367_v8 = vld [vmem:[%s1811_s1 + $0x10] sm:$0xff]  }
   0x3   :  { %v1362_v3 = vld [vmem:[%s1811_s1 + $0x80] sm:$0xff]   ;;  %1170 = vmatpush3.bf16.msra.mxu0 %v1361_v2  ;;  %v1365_v6 = vld [vmem:[%s1811_s1 + $0x88] sm:$0xff]   ;;  %v1368_v9 = vld [vmem:[%s1811_s1 + $0x90] sm:$0xff]  }
   0x4   :  { %1271 = vmatpush3.bf16.msra.mxu1 %v1362_v3  ;;  %1171 = vmatprep.subr.bf16.mxu0 %v1363_v4  ;;  %v1369_v10 = vld [vmem:[%s1811_s1 + $0x58] sm:$0xff]   ;;  %v1372_v13 = vld [vmem:[%s1811_s1 + $0x60] sm:$0xff]   ;;  %v1375_v16 = vld [vmem:[%s1811_s1 + $0x68] sm:$0xff]  }
   0x5   :  { %1272 = vmatprep.subr.bf16.mxu1 %v1464_v1  ;;  %v1370_v11 = vld [vmem:[%s1811_s1 + $0x18] sm:$0xff]   ;;  %v1373_v14 = vld [vmem:[%s1811_s1 + $0x20] sm:$0xff]   ;;  %v1376_v17 = vld [vmem:[%s1811_s1 + $0x28] sm:$0xff]  }
   0x6   :  { %v1371_v12 = vld [vmem:[%s1811_s1 + $0x98] sm:$0xff]   ;;  %v1374_v15 = vld [vmem:[%s1811_s1 + $0xa0] sm:$0xff]   ;;  %v1377_v18 = vld [vmem:[%s1811_s1 + $0xa8] sm:$0xff]  }
   0x7   :  { %1172 = vmatpush3.bf16.msra.mxu0 %v1364_v5  ;;  %v1378_v19 = vld [vmem:[%s1811_s1 + $0x70] sm:$0xff]   ;;  %v1381_v22 = vld [vmem:[%s1811_s1 + $0x78] sm:$0xff]   ;;  %v20_v23 = vld [vmem:[%s1810_s0 + $0x8] sm:$0xff] }
   0x8   :  { %1273 = vmatpush3.bf16.msra.mxu1 %v1365_v6  ;;  %1173 = vmatprep.subr.bf16.mxu0 %v1366_v7  ;;  %v1379_v20 = vld [vmem:[%s1811_s1 + $0x30] sm:$0xff]   ;;  %v23_v24 = vld [vmem:[%s1810_s0 + $0x20] sm:$0xff]  ;;  %v1382_v25 = vld [vmem:[%s1811_s1 + $0x38] sm:$0xff]  }
   0x9   :  { %1274 = vmatprep.subr.bf16.mxu1 %v1464_v1  ;;  %v1380_v21 = vld [vmem:[%s1811_s1 + $0xb0] sm:$0xff]   ;;  %v1579_v26 = vpack.c.bf16 %v23_v24, %v20_v23  ;;  %v1383_v27 = vld [vmem:[%s1811_s1 + $0xb8] sm:$0xff]   ;;  %v19_v28 = vld [vmem:[%s1810_s0] sm:$0xff] }
   0xa   :  { %v22_v29 = vld [vmem:[%s1810_s0 + $0x18] sm:$0xff]  ;;  %v1384_v30 = vld [vmem:[%s1812_s2 + $0x40] sm:$0xff]   ;;  %v21_v31 = vld [vmem:[%s1810_s0 + $0x10] sm:$0xff] }
   0xb   :  { %1174 = vmatpush3.bf16.msra.mxu0 %v1367_v8  ;;  %252 = vmatprep.mubr.bf16.mxu0 %v1579_v26  ;;  %v24_v32 = vld [vmem:[%s1810_s0 + $0x28] sm:$0xff]  ;;  %v1601_v33 = vpack.c.bf16 %v22_v29, %v19_v28  ;;  %v1385_v34 = vld [vmem:[%s1812_s2] sm:$0xff]   ;;  %v1390_v40 = vld [vmem:[%s1812_s2 + $0x50] sm:$0xff]  }
   0xc   :  { %1275 = vmatpush3.bf16.msra.mxu1 %v1368_v9  ;;  %1175 = vmatprep.subr.bf16.mxu0 %v1369_v10  ;;  %v1606_v35 = vpack.c.bf16 %v24_v32, %v21_v31  ;;  %v1386_v36 = vld [vmem:[%s1812_s2 + $0x80] sm:$0xff]   ;;  %v1387_v37 = vld [vmem:[%s1812_s2 + $0x48] sm:$0xff]   ;;  %v1391_v41 = vld [vmem:[%s1812_s2 + $0x10] sm:$0xff]  }
   0xd   :  { %1276 = vmatprep.subr.bf16.mxu1 %v1464_v1  ;;  %v1388_v38 = vld [vmem:[%s1812_s2 + $0x8] sm:$0xff]   ;;  %v1392_v42 = vld [vmem:[%s1812_s2 + $0x90] sm:$0xff]   ;;  %v1393_v43 = vld [vmem:[%s1812_s2 + $0x58] sm:$0xff]  }
   0xe   :  { %v1389_v39 = vld [vmem:[%s1812_s2 + $0x88] sm:$0xff]   ;;  %v1394_v44 = vld [vmem:[%s1812_s2 + $0x18] sm:$0xff]   ;;  %v1396_v46 = vld [vmem:[%s1812_s2 + $0x60] sm:$0xff]  }
   0xf   :  { %1176 = vmatpush3.bf16.msra.mxu0 %v1370_v11  ;;  %v1395_v45 = vld [vmem:[%s1812_s2 + $0x98] sm:$0xff]   ;;  %v1397_v47 = vld [vmem:[%s1812_s2 + $0x20] sm:$0xff]   ;;  %v1399_v49 = vld [vmem:[%s1812_s2 + $0x68] sm:$0xff]  }
  0x10   :  { %1277 = vmatpush3.bf16.msra.mxu1 %v1371_v12  ;;  %1177 = vmatprep.subr.bf16.mxu0 %v1372_v13  ;;  %v1398_v48 = vld [vmem:[%s1812_s2 + $0xa0] sm:$0xff]   ;;  %v1400_v50 = vld [vmem:[%s1812_s2 + $0x28] sm:$0xff]   ;;  %v1402_v52 = vld [vmem:[%s1812_s2 + $0x70] sm:$0xff]  }
  0x11   :  { %1278 = vmatprep.subr.bf16.mxu1 %v1464_v1  ;;  %v1401_v51 = vld [vmem:[%s1812_s2 + $0xa8] sm:$0xff]   ;;  %v1403_v53 = vld [vmem:[%s1812_s2 + $0x30] sm:$0xff]   ;;  %v1405_v55 = vld [vmem:[%s1812_s2 + $0x78] sm:$0xff]  }
  0x12   :  { %v1404_v54 = vld [vmem:[%s1812_s2 + $0xb0] sm:$0xff]   ;;  %v1406_v56 = vld [vmem:[%s1812_s2 + $0x38] sm:$0xff]   ;;  %v1408_v58 = vld [vmem:[%s1813_s3 + $0x40] sm:$0xff]  }
  0x13   :  { %1178 = vmatpush3.bf16.msra.mxu0 %v1373_v14  ;;  %v1407_v57 = vld [vmem:[%s1812_s2 + $0xb8] sm:$0xff]   ;;  %v1409_v59 = vld [vmem:[%s1813_s3] sm:$0xff]   ;;  %v1411_v61 = vld [vmem:[%s1813_s3 + $0x48] sm:$0xff]  }
  0x14   :  { %1279 = vmatpush3.bf16.msra.mxu1 %v1374_v15  ;;  %1179 = vmatprep.subr.bf16.mxu0 %v1375_v16  ;;  %v1410_v60 = vld [vmem:[%s1813_s3 + $0x80] sm:$0xff]   ;;  %v1412_v62 = vld [vmem:[%s1813_s3 + $0x8] sm:$0xff]   ;;  %v1414_v0 = vld [vmem:[%s1813_s3 + $0x50] sm:$0xff]  }
  0x15   :  { %1280 = vmatprep.subr.bf16.mxu1 %v1464_v1  ;;  %v1413_v63 = vld [vmem:[%s1813_s3 + $0x88] sm:$0xff]   ;;  %v1415_v2 = vld [vmem:[%s1813_s3 + $0x10] sm:$0xff]   ;;  %v1417_v4 = vld [vmem:[%s1813_s3 + $0x58] sm:$0xff]  }
  0x16   :  { %v1416_v3 = vld [vmem:[%s1813_s3 + $0x90] sm:$0xff]  }
  0x17   :  { %1180 = vmatpush3.bf16.msra.mxu0 %v1376_v17 }
  0x18   :  { %1281 = vmatpush3.bf16.msra.mxu1 %v1377_v18  ;;  %1181 = vmatprep.subr.bf16.mxu0 %v1378_v19 }
  0x19   :  { %1282 = vmatprep.subr.bf16.mxu1 %v1464_v1 }
  0x1b   :  { %1182 = vmatpush3.bf16.msra.mxu0 %v1379_v20 }
  0x1c   :  { %1283 = vmatpush3.bf16.msra.mxu1 %v1380_v21  ;;  %1183 = vmatprep.subr.bf16.mxu0 %v1381_v22 }
  0x1d   :  { %1284 = vmatprep.subr.bf16.mxu1 %v1464_v1 }
  0x1f   :  { %1184 = vmatpush3.bf16.msra.mxu0 %v1382_v25 }
  0x20   :  { %1285 = vmatpush3.bf16.msra.mxu1 %v1383_v27  ;;  %1200 = vmatprep.subr.bf16.mxu0 %v1384_v30 }
  0x21   :  { %1290 = vmatprep.subr.bf16.mxu1 %v1464_v1 }
  0x22   :  { %253 = vmatmul.mubr.bf16.vlgmr.msra.gmra.mrb[0].mxu0 %v1601_v33 }
  0x23   :  { %1287 = vmatmul.mubr.bf16.vlgmr.msra.gmra.mrb[0].mxu1 %v1606_v35  ;;  %1201 = vmatpush3.bf16.msra.mxu0 %v1385_v34 }
  0x24   :  { %1291 = vmatpush3.bf16.msra.mxu1 %v1386_v36  ;;  %1202 = vmatprep.subr.bf16.mxu0 %v1387_v37 }
  0x25   :  { %1292 = vmatprep.subr.bf16.mxu1 %v1464_v1  ;;  %526 = vmatprep.mubr.bf16.mxu0 %v1579_v26 }
  0x26   :  { %1306 = vmatprep.mubr.msk.bf16.mxu1 %vm1465_vm0, %v1464_v1 }
  0x27   :  { %1203 = vmatpush3.bf16.msra.mxu0 %v1388_v38 }
  0x28   :  { %1293 = vmatpush3.bf16.msra.mxu1 %v1389_v39  ;;  %1204 = vmatprep.subr.bf16.mxu0 %v1390_v40 }
  0x29   :  { %1294 = vmatprep.subr.bf16.mxu1 %v1464_v1 }
  0x2b   :  { %1205 = vmatpush3.bf16.msra.mxu0 %v1391_v41 }
  0x2c   :  { %1295 = vmatpush3.bf16.msra.mxu1 %v1392_v42  ;;  %1206 = vmatprep.subr.bf16.mxu0 %v1393_v43 }
  0x2d   :  { %1296 = vmatprep.subr.bf16.mxu1 %v1464_v1 }
  0x2f   :  { %1207 = vmatpush3.bf16.msra.mxu0 %v1394_v44 }
  0x30   :  { %1297 = vmatpush3.bf16.msra.mxu1 %v1395_v45  ;;  %1208 = vmatprep.subr.bf16.mxu0 %v1396_v46 }
  0x31   :  { %1298 = vmatprep.subr.bf16.mxu1 %v1464_v1 }
  0x33   :  { %1209 = vmatpush3.bf16.msra.mxu0 %v1397_v47 }
  0x34   :  { %1299 = vmatpush3.bf16.msra.mxu1 %v1398_v48  ;;  %1210 = vmatprep.subr.bf16.mxu0 %v1399_v49 }
  0x35   :  { %1300 = vmatprep.subr.bf16.mxu1 %v1464_v1 }
  0x37   :  { %1211 = vmatpush3.bf16.msra.mxu0 %v1400_v50 }
  0x38   :  { %1301 = vmatpush3.bf16.msra.mxu1 %v1401_v51  ;;  %1212 = vmatprep.subr.bf16.mxu0 %v1402_v52 }
  0x39   :  { %1302 = vmatprep.subr.bf16.mxu1 %v1464_v1 }
  0x3b   :  { %1213 = vmatpush3.bf16.msra.mxu0 %v1403_v53 }
  0x3c   :  { %1303 = vmatpush3.bf16.msra.mxu1 %v1404_v54  ;;  %1214 = vmatprep.subr.bf16.mxu0 %v1405_v55 }
  0x3d   :  { %1304 = vmatprep.subr.bf16.mxu1 %v1464_v1 }
  0x3f   :  { %1215 = vmatpush3.bf16.msra.mxu0 %v1406_v56 }
  0x40   :  { %1305 = vmatpush3.bf16.msra.mxu1 %v1407_v57  ;;  %1231 = vmatprep.subr.bf16.mxu0 %v1408_v58 }
  0x41   :  { %1310 = vmatprep.subr.bf16.mxu1 %v1464_v1 }
  0x42   :  { %527 = vmatmul.mubr.bf16.vlgmr.msra.gmra.mrb[4].mxu0 %v1601_v33 }
  0x43   :  { %1307 = vmatmul.mubr.bf16.vlgmr.msra.gmra.mrb[4].mxu1 %v1606_v35  ;;  %1232 = vmatpush3.bf16.msra.mxu0 %v1409_v59 }
  0x44   :  { %1311 = vmatpush3.bf16.msra.mxu1 %v1410_v60  ;;  %1233 = vmatprep.subr.bf16.mxu0 %v1411_v61 }
  0x45   :  { %1312 = vmatprep.subr.bf16.mxu1 %v1464_v1  ;;  %800 = vmatprep.mubr.bf16.mxu0 %v1579_v26 }
  0x46   :  { %1326 = vmatprep.mubr.msk.bf16.mxu1 %vm1465_vm0, %v1464_v1 }
  0x47   :  { %1234 = vmatpush3.bf16.msra.mxu0 %v1412_v62 }
  0x48   :  { %1313 = vmatpush3.bf16.msra.mxu1 %v1413_v63  ;;  %1235 = vmatprep.subr.bf16.mxu0 %v1414_v0 }
  0x49   :  { %1314 = vmatprep.subr.bf16.mxu1 %v1464_v1 }
  0x4a   :  { %9 = vsyncpa [#allocation3], 0  ;;  %v1418_v5 = vld [vmem:[%s1813_s3 + $0x18] sm:$0xff]   ;;  %v1420_v7 = vld [vmem:[%s1813_s3 + $0x60] sm:$0xff]   ;;  %vm864_vm1 = vcmask 523264   ;;  %vm985_vm2 = vcmask 1043456  }
  0x4b   :  { %1236 = vmatpush3.bf16.msra.mxu0 %v1415_v2  ;;  %v1419_v6 = vld [vmem:[%s1813_s3 + $0x98] sm:$0xff]   ;;  %v1421_v8 = vld [vmem:[%s1813_s3 + $0x20] sm:$0xff]   ;;  %v1423_v10 = vld [vmem:[%s1813_s3 + $0x68] sm:$0xff]   ;;  %vm957_vm4 = vcmask 64512  }
  0x4c   :  { %1315 = vmatpush3.bf16.msra.mxu1 %v1416_v3  ;;  %1237 = vmatprep.subr.bf16.mxu0 %v1417_v4  ;;  %v1422_v9 = vld [vmem:[%s1813_s3 + $0xa0] sm:$0xff]   ;;  %v1424_v11 = vld [vmem:[%s1813_s3 + $0x28] sm:$0xff]   ;;  %v1426_v13 = vld [vmem:[%s1813_s3 + $0x70] sm:$0xff]  }
  0x4d   :  { %1316 = vmatprep.subr.bf16.mxu1 %v1464_v1  ;;  %v1425_v12 = vld [vmem:[%s1813_s3 + $0xa8] sm:$0xff]   ;;  %v1427_v14 = vld [vmem:[%s1813_s3 + $0x30] sm:$0xff]   ;;  %v1429_v16 = vld [vmem:[%s1813_s3 + $0x78] sm:$0xff]  }
  0x4e   :  { %v1428_v15 = vld [vmem:[%s1813_s3 + $0xb0] sm:$0xff]   ;;  %v1430_v17 = vld [vmem:[%s1813_s3 + $0x38] sm:$0xff]  }
  0x4f   :  { %1238 = vmatpush3.bf16.msra.mxu0 %v1418_v5  ;;  %v1431_v18 = vld [vmem:[%s1813_s3 + $0xb8] sm:$0xff]   ;;  %s1467_s3 = smov [#allocation2]  }
  0x50   :  { %1317 = vmatpush3.bf16.msra.mxu1 %v1419_v6  ;;  %1239 = vmatprep.subr.bf16.mxu0 %v1420_v7  ;;  %v1466_v6 = vmov -1e+30   ;;  %s1082_s5 = sshll.u32 %s1467_s3, 4  ;;  %s1083_s5 = int_to_ptr.vmem [resolvable:$true] %s1082_s5 }
  0x51   :  { %1318 = vmatprep.subr.bf16.mxu1 %v1464_v1  ;;  %s1440_s6 = scalar_lea.vmem %s1083_s5, 256  ;;  %p1445_p1 = scmp.lt.s32.totalorder %s1083_s5, %s1083_s5 }
  0x52   :  { %p1441_p0 = scmp.ne.s32.totalorder %s1083_s5, %s1440_s6  ;;  %p1446_p2 = scmp.lt.s32.totalorder %s1440_s6, %s1440_s6 }
  0x53   :  { %1240 = vmatpush3.bf16.msra.mxu0 %v1421_v8 }
  0x54   :  { %1319 = vmatpush3.bf16.msra.mxu1 %v1422_v9  ;;  %1241 = vmatprep.subr.bf16.mxu0 %v1423_v10  ;;  %p1447_p3 = por %p1446_p2, %p1445_p1 }
  0x55   :  { %1320 = vmatprep.subr.bf16.mxu1 %v1464_v1 }
  0x56   :  { %p1448_p4 = pnand %p1447_p3, %p1441_p0 }
  0x57   :  { %1242 = vmatpush3.bf16.msra.mxu0 %v1424_v11 }
  0x58   :  { %1321 = vmatpush3.bf16.msra.mxu1 %v1425_v12  ;;  %1243 = vmatprep.subr.bf16.mxu0 %v1426_v13 }
  0x59   :  { %1322 = vmatprep.subr.bf16.mxu1 %v1464_v1 }
  0x5b   :  { %1244 = vmatpush3.bf16.msra.mxu0 %v1427_v14 }
  0x5c   :  { %1323 = vmatpush3.bf16.msra.mxu1 %v1428_v15  ;;  %1245 = vmatprep.subr.bf16.mxu0 %v1429_v16 }
  0x5d   :  { %1324 = vmatprep.subr.bf16.mxu1 %v1464_v1 }
  0x5f   :  { %1246 = vmatpush3.bf16.msra.mxu0 %v1430_v17 }
  0x60   :  { %1330 = vmatprep.subr.bf16.mxu0 %v1464_v1  ;;  %1325 = vmatpush3.bf16.msra.mxu1 %v1431_v18 }
  0x61   :  { %1336 = vmatprep.subr.bf16.mxu1 %v1464_v1 }
  0x62   :  { %801 = vmatmul.mubr.bf16.vlgmr.msra.gmra.mrb[8].mxu0 %v1601_v33 }
  0x63   :  { %1332 = vmatprep.mubr.msk.bf16.mxu0 %vm1465_vm0, %v1464_v1  ;;  %1327 = vmatmul.mubr.bf16.vlgmr.msra.gmra.mrb[8].mxu1 %v1606_v35 }
  0x64   :  { %1338 = vmatprep.mubr.msk.bf16.mxu1 %vm1465_vm0, %v1464_v1 }
  0xf5   :  { %v1185_v19 = vpop.f32.mrb[0].mxu0 }
  0xf6   :  { %v1186_v20 = vpop.f32.mrb[1].mxu0  ;;  %v295_v21 = vpop.f32.mrb[0].mxu1 }
  0xf7   :  { %v1187_v22 = vadd.f32 %v1186_v20, %v1185_v19  ;;  %v1188_v23 = vpop.f32.mrb[2].mxu0  ;;  %v1288_v24 = vpop.f32.mrb[1].mxu1 }
  0xf8   :  { %v1189_v25 = vpop.f32.mrb[3].mxu0  ;;  %v298_v26 = vpop.f32.mrb[2].mxu1 }
  0xf9   :  { %v296_v27 = vadd.f32 %v1187_v22, %v295_v21  ;;  %v1190_v28 = vadd.f32 %v1189_v25, %v1188_v23  ;;  %v1289_v29 = vpop.f32.mrb[3].mxu1 }
  0xfb   :  { %v854_v30 = vpack.c.bf16 %v296_v27, %v296_v27  ;;  %v299_v31 = vadd.f32 %v1190_v28, %v298_v26 }
  0xfd   :  { %v869_v32 = vsel %vm864_vm1, %v854_v30, 0  ;;  %v855_v33 = vpack.c.bf16 %v299_v31, %v299_v31 }
  0xfe   :  { %1331 = vmatpush3.bf16.xpose.msra.mxu0 %v869_v32 }
  0xff   :  { %v915_v34 = vsel %vm864_vm1, %v855_v33, 0  ;;  %1342 = vmatprep.subr.bf16.mxu0 %v1464_v1 }
 0x100   :  { %1337 = vmatpush3.bf16.xpose.msra.mxu1 %v915_v34 }
 0x101   :  { %1348 = vmatprep.subr.bf16.mxu1 %v1464_v1 }
 0x115   :  { %v1216_v35 = vpop.f32.mrb[4].mxu0 }
 0x116   :  { %v569_v36 = vpop.f32.mrb[4].mxu1  ;;  %v1217_v37 = vpop.f32.mrb[5].mxu0 }
 0x117   :  { %v1218_v38 = vadd.f32 %v1217_v37, %v1216_v35  ;;  %v1308_v39 = vpop.f32.mrb[5].mxu1  ;;  %v1219_v40 = vpop.f32.mrb[6].mxu0 }
 0x118   :  { %v572_v41 = vpop.f32.mrb[6].mxu1  ;;  %v1220_v42 = vpop.f32.mrb[7].mxu0 }
 0x119   :  { %v570_v43 = vadd.f32 %v1218_v38, %v569_v36  ;;  %v1221_v44 = vadd.f32 %v1220_v42, %v1219_v40  ;;  %v1309_v45 = vpop.f32.mrb[7].mxu1 }
 0x11b   :  { %v850_v46 = vmul.f32 0.125, %v570_v43  ;;  %v573_v47 = vadd.f32 %v1221_v44, %v572_v41 }
 0x11d   :  { %v852_v48 = vpack.c.bf16 %v850_v46, %v850_v46  ;;  %v851_v49 = vmul.f32 0.125, %v573_v47 }
 0x11f   :  { %v853_v50 = vpack.c.bf16 %v851_v49, %v851_v49  ;;  %1333 = vmatmul.mubr.msk.bf16.vlgmr.msra.gmra.mrb[12].mxu0 %vm864_vm1, %v852_v48 }
 0x120   :  { %1344 = vmatprep.mubr.msk.bf16.mxu0 %vm1465_vm0, %v1464_v1 }
 0x121   :  { %1339 = vmatmul.mubr.msk.bf16.vlgmr.msra.gmra.mrb[12].mxu1 %vm864_vm1, %v853_v50 }
 0x122   :  { %1350 = vmatprep.mubr.msk.bf16.mxu1 %vm1465_vm0, %v1464_v1  ;;  %v858_v1 = vlaneseq }
 0x124   :  { %v859_v4 = vshrl.u32 %v858_v1, 7  ;;  %v861_v5 = vand.u32 127, %v858_v1 }
 0x126   :  { %vm862_vm3 = vcmp.ge.s32.totalorder %v859_v4, %v861_v5 }
 0x127   :  { %v863_v7 = vsel %vm862_vm3, 0.0, %v1466_v6 }
 0x135   :  { %v1247_v51 = vpop.f32.mrb[8].mxu0 }
 0x136   :  { %v1248_v52 = vpop.f32.mrb[9].mxu0  ;;  %v843_v55 = vpop.f32.mrb[8].mxu1 }
 0x137   :  { %v1249_v53 = vadd.f32 %v1248_v52, %v1247_v51  ;;  %v1250_v54 = vpop.f32.mrb[10].mxu0  ;;  %v1328_v57 = vpop.f32.mrb[9].mxu1 }
 0x138   :  { %v1251_v56 = vpop.f32.mrb[11].mxu0  ;;  %v846_v60 = vpop.f32.mrb[10].mxu1 }
 0x139   :  { %v1252_v58 = vadd.f32 %v1251_v56, %v1250_v54  ;;  %v844_v59 = vadd.f32 %v1249_v53, %v843_v55  ;;  %v1329_v61 = vpop.f32.mrb[11].mxu1 }
 0x13b   :  { %v856_v62 = vpack.c.bf16 %v844_v59, %v844_v59  ;;  %v847_v63 = vadd.f32 %v1252_v58, %v846_v60 }
 0x13d   :  { %v987_v0 = vsel %vm985_vm2, %v856_v62, 0  ;;  %v857_v2 = vpack.c.bf16 %v847_v63, %v847_v63 }
 0x13e   :  { %1343 = vmatpush3.bf16.msra.mxu0 %v987_v0 }
 0x13f   :  { %v1033_v3 = vsel %vm985_vm2, %v857_v2, 0 }
 0x140   :  { %1349 = vmatpush3.bf16.msra.mxu1 %v1033_v3 }
 0x1f2   :  { %v905_v8 = vpop.f32.mrb[12].mxu0 }
 0x1f3   :  { %v906_v9 = vadd.f32 %v905_v8, %v863_v7  ;;  %v1334_v10 = vpop.f32.mrb[13].mxu0 }
 0x1f4   :  { %v908_v11 = vpop.f32.mrb[14].mxu0  ;;  %v951_v12 = vpop.f32.mrb[12].mxu1 }
 0x1f5   :  { %v952_v13 = vadd.f32 %v951_v12, %v863_v7  ;;  %v1335_v14 = vpop.f32.mrb[15].mxu0  ;;  %v1340_v15 = vpop.f32.mrb[13].mxu1  ;;  %v958_v16 = vsel %vm957_vm4, %v906_v9, -inf }
 0x1f6   :  { %v954_v17 = vpop.f32.mrb[14].mxu1  ;;  %959 = vmax.xlane.f32.xlu0 %v958_v16 }
 0x1f7   :  { %v1341_v18 = vpop.f32.mrb[15].mxu1  ;;  %v961_v19 = vsel %vm957_vm4, %v952_v13, -inf }
 0x1fa   :  { %962 = vmax.xlane.f32.xlu0 %v961_v19 }
 0x283   :  { %v960_v20 = vpop.xlane.xlu0 %959 }
 0x284   :  { %v964_v21 = vsub.f32 %v906_v9, %v960_v20 }
 0x286   :  { %v966_v22 = vmul.f32 1.442695, %v964_v21 }
 0x287   :  { %v963_v23 = vpop.xlane.xlu0 %962 }
 0x288   :  { %1432 = vpow2.f32 %v966_v22  ;;  %v965_v24 = vsub.f32 %v952_v13, %v963_v23 }
 0x28a   :  { %v968_v25 = vmul.f32 1.442695, %v965_v24 }
 0x28c   :  { %1434 = vpow2.f32 %v968_v25 }
 0x292   :  { %v1433_v26 = vpop.eup %1432 }
 0x293   :  { %v970_v27 = vsel %vm957_vm4, %v1433_v26, 0.0 }
 0x294   :  { %971 = vadd.xlane.f32.xlu1 %v970_v27 }
 0x296   :  { %v1435_v28 = vpop.eup %1434 }
 0x297   :  { %v973_v29 = vsel %vm957_vm4, %v1435_v28, 0.0 }
 0x298   :  { %974 = vadd.xlane.f32.xlu1 %v973_v29 }
 0x321   :  { %v972_v30 = vpop.xlane.xlu1 %971 }
 0x322   :  { %1436 = vrcp.f32 %v972_v30 }
 0x325   :  { %v975_v31 = vpop.xlane.xlu1 %974 }
 0x326   :  { %1438 = vrcp.f32 %v975_v31 }
 0x32c   :  { %v1437_v32 = vpop.eup %1436 }
 0x32d   :  { %v978_v33 = vmul.f32 %v1437_v32, %v1433_v26 }
 0x32f   :  { %v980_v34 = vpack.c.bf16 %v978_v33, %v978_v33 }
 0x330   :  { %v1439_v35 = vpop.eup %1438 }
 0x331   :  { %v979_v36 = vmul.f32 %v1439_v35, %v1435_v28  ;;  %1345 = vmatmul.mubr.msk.bf16.vlgmr.msra.gmra.mrb[16].mxu0 %vm957_vm4, %v980_v34 }
 0x333   :  { %v981_v37 = vpack.c.bf16 %v979_v36, %v979_v36 }
 0x335   :  { %1351 = vmatmul.mubr.msk.bf16.vlgmr.msra.gmra.mrb[16].mxu1 %vm957_vm4, %v981_v37 }
 0x404   :  { %v1023_v38 = vpop.f32.mrb[16].mxu0 }
 0x405   :  { %1075 = vst.msk [vmem:[#allocation2] sm:$0xff] %vm864_vm1, %v1023_v38  ;;  %v1346_v39 = vpop.f32.mrb[17].mxu0 }
 0x406   :  { %v1026_v40 = vpop.f32.mrb[18].mxu0 }
 0x407   :  { %v1347_v41 = vpop.f32.mrb[19].mxu0 }
 0x408   :  { %v1069_v42 = vpop.f32.mrb[16].mxu1 }
 0x409   :  { %1076 = vst.msk [vmem:[#allocation2 + $0x8] sm:$0xff] %vm864_vm1, %v1069_v42  ;;  %v1352_v43 = vpop.f32.mrb[17].mxu1 }
 0x40a   :  { %v1072_v44 = vpop.f32.mrb[18].mxu1 }
 0x40b   :  { %1451 = shalt.err (!%p1448_p4)
}
 0x40c   :  { %s1452_s9 = scalar_lea.hbm %s1814_s4, 256 }
 0x40d   :  { %p1453_p5 = scmp.ne.s32.totalorder %s1814_s4, %s1452_s9  ;;  %p1456_p6 = scmp.lt.u32.totalorder %s1452_s9, %s1814_s4 }
 0x40f   :  { %p1458_p7 = pnand %p1456_p6, %p1453_p5 }
 0x411   :  { %1461 = shalt.err (!%p1458_p7)
}
 0x412   :  { %s1468_s14 = smov 128   ;;  %s1469_s15 = smov 8   ;;  %v1353_v45 = vpop.f32.mrb[19].mxu1 }
 0x413   :  { %1088 = dma.vmem_to_hbm [thread:$0]  %s1083_s5, 256, %s1814_s4, [#allocation3], %s1468_s14, %s1468_s14, %s1469_s15  }
 0x414   :  { %1462 = dma.done.wait [#allocation3], 256  }
 0x415   :  { %1463 = vsyncadd [#allocation3], 4294967040 }
 0x416   :  { %1092 = vsyncpa [#allocation3], 1 }

</bundles_post_ra>
